<compile_context>
chip_gen: v5e
topology: v5e:2x2
jax: 0.10.0
libtpu: 0.0.40
codegen_flags: <defaults>
</compile_context>

<pallas_src>
import jax
import jax.numpy as jnp
from jax.experimental import pallas as pl
from jax.experimental.pallas import tpu as pltpu


def _identity_residual_kernel(res_ref, o_ref):
    # Pure pass-through: DMA-bound copy, nothing to compute.
    o_ref[...] = res_ref[...]


def identity_residual(out: jax.Array, res: jax.Array) -> jax.Array:
    """Pallas equivalent of IdentityResidual.forward(out, res) -> res.

    `out` is accepted for signature parity but (like the PyTorch module) is
    never read.  The materialized copy of `res` is performed inside a Pallas
    kernel with the output HBM buffer aliased to the input.
    """
    del out  # ignored, matching the PyTorch module semantics

    orig_shape = res.shape
    n = res.size
    if n == 0:
        # Nothing to copy; kernel launch would be pure overhead.
        return res

    itemsize = jnp.dtype(res.dtype).itemsize

    # Pick the widest lane dimension (multiple of 128) that tiles the array
    # exactly, so every vector store is unmasked and fully lane-dense.
    lane = 0
    for cand in (2048, 1024, 512, 256, 128):
        if n % cand == 0:
            lane = cand
            break

    if lane:
        rows = n // lane
        slab = res.reshape(rows, lane)  # contiguous reshape: no extra HBM pass

        # ~4 MiB blocks: 2 (double-buffer) x 2 (in + out) x 4 MiB = 16 MiB of
        # VMEM, comfortably inside the 32 MiB scoped limit on all targets.
        target_block_bytes = 4 * 1024 * 1024
        bytes_per_row = lane * itemsize
        block_rows = min(rows, max(1, target_block_bytes // bytes_per_row))
        if block_rows < rows:
            # Partial tiling: second-last block dim must be a multiple of 8.
            block_rows = min(rows, max(8, (block_rows // 8) * 8))
        grid = (pl.cdiv(rows, block_rows),)
        block_shape = (block_rows, lane)
        index_map = lambda i: (i, 0)
    else:
        # Rare: element count not a multiple of 128.  Use one full-array block
        # (block dims equal to full array dims -> (8,128) rule exception).
        slab = res.reshape(1, n)
        grid = (1,)
        block_shape = (1, n)
        index_map = lambda i: (0, 0)

    copied = pl.pallas_call(
        _identity_residual_kernel,
        out_shape=jax.ShapeDtypeStruct(slab.shape, slab.dtype),
        grid_spec=pltpu.PrefetchScalarGridSpec(
            num_scalar_prefetch=0,
            grid=grid,
            in_specs=[pl.BlockSpec(block_shape, index_map)],
            out_specs=pl.BlockSpec(block_shape, index_map),
        ),
        compiler_params=pltpu.CompilerParams(
            dimension_semantics=("parallel",),
            vmem_limit_bytes=32 * 1024 * 1024,
        ),
        # Output is bit-identical to the input; alias so XLA can reuse the
        # HBM buffer and skip the redundant round trip when `res` is dead.
        input_output_aliases={0: 0},
    )(slab)

    return copied.reshape(orig_shape)


if __name__ == "__main__":
    key = jax.random.PRNGKey(0)
    k1, k2 = jax.random.split(key)
    # Small NCHW shapes consistent with a conv-style residual block.
    out_t = jax.random.normal(k1, (2, 4, 16, 16), dtype=jnp.float32)
    res_t = jax.random.normal(k2, (2, 4, 16, 16), dtype=jnp.float32)

    y = identity_residual(out_t, res_t)
    jax.block_until_ready(y)

    assert y.shape == res_t.shape
    assert y.dtype == res_t.dtype
    assert bool(jnp.all(y == res_t))
    print("KERNEL_OK")
</pallas_src>

<mosaic_0001>
module attributes {stable_mosaic.version = 11 : i64} {
  func.func @_identity_residual_kernel(%arg0: i32, %arg1: memref<1x2048xf32, #tpu.memory_space<vmem>>, %arg2: memref<1x2048xf32, #tpu.memory_space<vmem>>) attributes {dimension_semantics = [#tpu.dimension_semantics<parallel>], iteration_bounds = array<i64: 1>, scalar_prefetch = 0 : i64, scratch_operands = 0 : i64, tpu.core_type = #tpu.core_type<tc>, window_params = [{transform_indices = @transform_0, window_bounds = array<i64: 1, 2048>}, {transform_indices = @transform_1, window_bounds = array<i64: 1, 2048>}]} {
    %c0 = arith.constant 0 : index
    %c0_0 = arith.constant 0 : index
    %0 = vector.load %arg1[%c0, %c0_0] : memref<1x2048xf32, #tpu.memory_space<vmem>>, vector<1x2048xf32>
    %c0_1 = arith.constant 0 : index
    %c0_2 = arith.constant 0 : index
    %1 = vector.load %arg2[%c0_1, %c0_2] : memref<1x2048xf32, #tpu.memory_space<vmem>>, vector<1x2048xf32>
    tpu.vector_store %arg2[%c0_1, %c0_2], %0 {strides = array<i32>} : memref<1x2048xf32, #tpu.memory_space<vmem>>, vector<1x2048xf32>,
    return
  }
  func.func @transform_0(%arg0: i32) -> (i32, i32) {
    %c0_i32 = arith.constant 0 : i32
    %c0_i32_0 = arith.constant 0 : i32
    return %arg0, %c0_i32 : i32, i32
  }
  func.func @transform_1(%arg0: i32) -> (i32, i32) {
    %c0_i32 = arith.constant 0 : i32
    %c0_i32_0 = arith.constant 0 : i32
    return %arg0, %c0_i32 : i32, i32
  }
}

</mosaic_0001>

<bundles_post_ra>
// kernel: tpu_custom_call.1
= control target key start
LH: loop header
LB: loop body
LE: loop exit
PB: predicated region body
PF: predicated region fallthrough
CT: control target
= control target key end

     0   :  { %6 = vsyncpa [#allocation3], 0  ;;  %s116_s0 = inlined_call_operand.hbm [shape: f32[1,2048], index: 0, kind: input, shape index: {}, may-alias: {0,1}]   ;;  %s117_s1 = inlined_call_operand.hbm [shape: f32[1,2048], index: 1, kind: output, shape index: {}, may-alias: {0,1}]  }
   0x1   :  { %7 = vsyncpa [#allocation4], 0  ;;  %s13_s8 = sshll.u32 %s116_s0, 4  ;;  %s98_s9 = smov [#allocation2]   ;;  %s14_s8 = int_to_ptr.hbm [resolvable:$true] %s13_s8 }
   0x2   :  { %s15_s10 = sshll.u32 %s98_s9, 4  ;;  %s16_s10 = int_to_ptr.vmem [resolvable:$true] %s15_s10 }
   0x3   :  { %18 = dma.hbm_to_vmem [thread:$0]  %s14_s8, 256, %s16_s10, [#allocation3]  }
   0x4   :  { %94 = dma.done.wait [#allocation3], 256  }
   0x5   :  { %95 = vsyncadd [#allocation3], 4294967040  ;;  %s99_s11 = smov [#allocation5]   ;;  %s34_s15 = sshll.u32 %s117_s1, 4  ;;  %v23_v0 = vld [vmem:[#allocation2] sm:$0xff]  ;;  %v24_v1 = vld [vmem:[#allocation2 + $0x8] sm:$0xff]  ;;  %s35_s15 = int_to_ptr.hbm [resolvable:$true] %s34_s15 }
   0x6   :  { %s32_s12 = sshll.u32 %s99_s11, 4  ;;  %25 = vst [vmem:[#allocation5] sm:$0xff] %v23_v0  ;;  %s33_s12 = int_to_ptr.vmem [resolvable:$true] %s32_s12 }
   0x7   :  { %26 = vst [vmem:[#allocation5 + $0x8] sm:$0xff] %v24_v1 }
   0x8   :  { %37 = dma.vmem_to_hbm [thread:$0]  %s33_s12, 256, %s35_s15, [#allocation4]  }
   0x9   :  { %96 = dma.done.wait [#allocation4], 256  }
   0xa   :  { %97 = vsyncadd [#allocation4], 4294967040 }
   0xb   :  { %42 = vsyncpa [#allocation3], 1 }
   0xc   :  { %43 = vsyncpa [#allocation4], 1 }

</bundles_post_ra>
